<compile_context>
chip_gen: v6e
topology: v6e:2x2x1
jax: 0.10.0
libtpu: 0.0.40
codegen_flags: <defaults>
</compile_context>

<pallas_src>
import numpy as np
import jax
import jax.numpy as jnp
from jax import lax
from jax.experimental import pallas as pl
from jax.experimental.pallas import tpu as pltpu

# ----------------------- module "init" configuration ------------------------
N_FFT = 64
HOP_LENGTH = 16
WIN_LENGTH = 64          # == n_fft, so no window center-padding needed
SAMPLE_RATE = 16000
N_MELS = 16
F_MIN = 0.0
F_MAX = 8000.0
PREEMPH = 0.97
N_FREQ = N_FFT // 2 + 1  # 33
N_PAD = N_FFT // 2       # 32


def _hz_to_mel(f):
    f = np.asarray(f, dtype=np.float64)
    f_sp = 200.0 / 3.0
    mels = f / f_sp
    min_log_hz = 1000.0
    min_log_mel = min_log_hz / f_sp
    logstep = np.log(6.4) / 27.0
    return np.where(f >= min_log_hz,
                    min_log_mel + np.log(np.maximum(f, 1e-10) / min_log_hz) / logstep,
                    mels)


def _mel_to_hz(m):
    m = np.asarray(m, dtype=np.float64)
    f_sp = 200.0 / 3.0
    freqs = f_sp * m
    min_log_hz = 1000.0
    min_log_mel = min_log_hz / f_sp
    logstep = np.log(6.4) / 27.0
    return np.where(m >= min_log_mel,
                    min_log_hz * np.exp(logstep * (m - min_log_mel)),
                    freqs)


def librosa_mel_fn(sr, n_fft, n_mels, fmin, fmax):
    """Slaney-style mel filterbank (librosa.filters.mel, htk=False, norm='slaney')."""
    n_freq = n_fft // 2 + 1
    fftfreqs = np.linspace(0.0, sr / 2.0, n_freq)
    mel_pts = _mel_to_hz(np.linspace(_hz_to_mel(fmin), _hz_to_mel(fmax), n_mels + 2))
    fdiff = np.diff(mel_pts)
    ramps = mel_pts[:, None] - fftfreqs[None, :]
    weights = np.zeros((n_mels, n_freq), dtype=np.float64)
    for i in range(n_mels):
        lower = -ramps[i] / fdiff[i]
        upper = ramps[i + 2] / fdiff[i + 1]
        weights[i] = np.maximum(0.0, np.minimum(lower, upper))
    enorm = 2.0 / (mel_pts[2:n_mels + 2] - mel_pts[:n_mels])
    weights *= enorm[:, None]
    return weights.astype(np.float32)


# ------------------- constant buffers (folded offline) ----------------------
# Periodic Hann window (matches torch.hann_window default periodic=True).
_n = np.arange(WIN_LENGTH, dtype=np.float64)
_window = 0.5 - 0.5 * np.cos(2.0 * np.pi * _n / WIN_LENGTH)

# Real-DFT basis with the window folded in; cos and -sin concatenated so the
# windowed DFT is a single (n_fft, 2*n_freq) matmul.
_nn = np.arange(N_FFT, dtype=np.float64)[:, None]
_kk = np.arange(N_FREQ, dtype=np.float64)[None, :]
_ang = 2.0 * np.pi * _nn * _kk / N_FFT
_wcos = _window[:, None] * np.cos(_ang)
_wsin = _window[:, None] * (-np.sin(_ang))
_wdft = np.concatenate([_wcos, _wsin], axis=1).astype(np.float32)    # (64, 66)

_mel_np = librosa_mel_fn(SAMPLE_RATE, N_FFT, N_MELS, F_MIN, F_MAX)   # (16, 33)
_flip_np = np.eye(N_PAD, dtype=np.float32)[::-1].copy()              # exchange matrix

WDFT = jnp.asarray(_wdft)        # (n_fft, 2*n_freq)
MEL = jnp.asarray(_mel_np)       # (n_mels, n_freq)
FLIP = jnp.asarray(_flip_np)     # (n_pad, n_pad)


# ------------------------------ Pallas kernel -------------------------------
def wav2mel_kernel(x_ref, flip_ref, wdft_ref, mel_ref, o_ref, yp_ref, fr_ref):
    """Fused Wav2Mel forward.

    x_ref    : (1, T)              raw waveform
    flip_ref : (N_PAD, N_PAD)      exchange (reversal) matrix
    wdft_ref : (N_FFT, 2*N_FREQ)   Hann-windowed [cos | -sin] DFT basis
    mel_ref  : (N_MELS, N_FREQ)    Slaney mel filterbank
    o_ref    : (N_MELS, n_frames)  log-mel output
    yp_ref   : (1, T + 2*N_PAD)    scratch: pre-emphasized + reflect-padded wav
    fr_ref   : (n_frames, N_FFT)   scratch: STFT frame matrix
    """
    t = x_ref.shape[1]
    n_frames = o_ref.shape[1]

    # 1) pre-emphasis: y[i] = x[i] - p * x[i-1], with x[-1] := 0
    #    (== conv1d with kernel [[-p, 1]], padding=1, drop last sample)
    x = x_ref[...]
    prev = pltpu.roll(x, shift=1, axis=1)
    lane = lax.broadcasted_iota(jnp.int32, x.shape, 1)
    prev = jnp.where(lane == 0, jnp.float32(0.0), prev)
    y = x - jnp.float32(PREEMPH) * prev                               # (1, T)

    # 2) reflect pad AFTER pre-emphasis (as in the reference):
    #    yp = [y[32..1], y[0..T-1], y[T-2..T-33]]
    #    Edge reversals are tiny constant matmuls with the exchange matrix.
    yp_ref[:, N_PAD:N_PAD + t] = y
    yp_ref[:, 0:N_PAD] = jnp.dot(
        y[:, 1:N_PAD + 1], flip_ref[...], preferred_element_type=jnp.float32)
    yp_ref[:, N_PAD + t:N_PAD + t + N_PAD] = jnp.dot(
        y[:, t - N_PAD - 1:t - 1], flip_ref[...], preferred_element_type=jnp.float32)

    # 3) framing (center=False STFT): frame f = yp[f*hop : f*hop + n_fft]
    for f in range(n_frames):                                         # static unroll
        fr_ref[pl.ds(f, 1), :] = yp_ref[:, f * HOP_LENGTH:f * HOP_LENGTH + N_FFT]

    # 4) windowed real DFT as ONE MXU matmul (window folded into weights,
    #    real and imaginary parts in the same 2*N_FREQ output columns)
    reim = jnp.dot(fr_ref[...], wdft_ref[...],
                   preferred_element_type=jnp.float32)                # (F, 2*n_freq)
    re = reim[:, :N_FREQ]
    im = reim[:, N_FREQ:]
    mag = jnp.sqrt(re * re + im * im)                                 # (F, n_freq)

    # 5) mel projection as MEL @ mag^T so the output is written directly in the
    #    reference (n_mels, n_frames) layout (no wrapper transpose).
    mel = lax.dot_general(mel_ref[...], mag,
                          dimension_numbers=(((1,), (1,)), ((), ())),
                          preferred_element_type=jnp.float32)         # (n_mels, F)
    o_ref[...] = jnp.log(jnp.maximum(mel, jnp.float32(1e-5)))


# -------------------------------- wrapper -----------------------------------
@jax.jit
def wav2mel(wav):
    """wav: (T,) float32 -> log-mel of shape (1, n_mels, n_frames)."""
    x = wav.reshape(1, -1).astype(jnp.float32)                        # (1, T)
    t = x.shape[1]
    assert t > N_PAD, "wav too short for reflect padding"
    padded_len = t + 2 * N_PAD
    n_frames = (padded_len - N_FFT) // HOP_LENGTH + 1

    out = pl.pallas_call(
        wav2mel_kernel,
        out_shape=jax.ShapeDtypeStruct((N_MELS, n_frames), jnp.float32),
        grid=(1,),
        in_specs=[
            pl.BlockSpec((1, t), lambda i: (0, 0)),
            pl.BlockSpec((N_PAD, N_PAD), lambda i: (0, 0)),
            pl.BlockSpec((N_FFT, 2 * N_FREQ), lambda i: (0, 0)),
            pl.BlockSpec((N_MELS, N_FREQ), lambda i: (0, 0)),
        ],
        out_specs=pl.BlockSpec((N_MELS, n_frames), lambda i: (0, 0)),
        scratch_shapes=[
            pltpu.VMEM((1, padded_len), jnp.float32),
            pltpu.VMEM((n_frames, N_FFT), jnp.float32),
        ],
        compiler_params=pltpu.CompilerParams(dimension_semantics=("arbitrary",)),
    )(x, FLIP, WDFT, MEL)

    # TODO(synk): for long audio, tile the frame axis with a grid (512+ frame
    # blocks, "parallel" to shard across v7x's two TensorCores, M>=256 rows per
    # matmul on v6e / 128 on v5e) instead of one monolithic block; at T=256
    # (17 frames) a single block is optimal and VMEM use is a few KB.
    return out[None, :, :]                                            # (1, n_mels, n_frames)


if __name__ == "__main__":
    key = jax.random.PRNGKey(0)
    T = 256
    wav = jax.random.normal(key, (T,), dtype=jnp.float32)

    log_mel = jax.block_until_ready(wav2mel(wav))

    n_frames_expected = (T + 2 * (N_FFT // 2) - N_FFT) // HOP_LENGTH + 1
    assert log_mel.shape == (1, N_MELS, n_frames_expected), log_mel.shape
    assert log_mel.dtype == jnp.float32
    assert bool(jnp.all(jnp.isfinite(log_mel)))
    print("KERNEL_OK")
</pallas_src>

<mosaic_0001>
module attributes {stable_mosaic.version = 11 : i64} {
  func.func @wav2mel_kernel(%arg0: i32, %arg1: memref<1x256xf32, #tpu.memory_space<vmem>>, %arg2: memref<32x32xf32, #tpu.memory_space<vmem>>, %arg3: memref<64x66xf32, #tpu.memory_space<vmem>>, %arg4: memref<16x33xf32, #tpu.memory_space<vmem>>, %arg5: memref<16x17xf32, #tpu.memory_space<vmem>>, %arg6: memref<1x320xf32, #tpu.memory_space<vmem>>, %arg7: memref<17x64xf32, #tpu.memory_space<vmem>>) attributes {dimension_semantics = [#tpu.dimension_semantics<arbitrary>], iteration_bounds = array<i64: 1>, scalar_prefetch = 0 : i64, scratch_operands = 2 : i64, tpu.core_type = #tpu.core_type<tc>, window_params = [{pipeline_mode = #tpu.pipeline_mode<synchronous>, transform_indices = @transform_0, window_bounds = array<i64: 1, 256>}, {pipeline_mode = #tpu.pipeline_mode<synchronous>, transform_indices = @transform_1, window_bounds = array<i64: 32, 32>}, {pipeline_mode = #tpu.pipeline_mode<synchronous>, transform_indices = @transform_2, window_bounds = array<i64: 64, 66>}, {pipeline_mode = #tpu.pipeline_mode<synchronous>, transform_indices = @transform_3, window_bounds = array<i64: 16, 33>}, {pipeline_mode = #tpu.pipeline_mode<synchronous>, transform_indices = @transform_4, window_bounds = array<i64: 16, 17>}]} {
    %c0 = arith.constant 0 : index
    %c0_0 = arith.constant 0 : index
    %0 = vector.load %arg1[%c0, %c0_0] : memref<1x256xf32, #tpu.memory_space<vmem>>, vector<1x256xf32>
    %c1_i32 = arith.constant 1 : i32
    %1 = tpu.dynamic_rotate %0 by %c1_i32 dim 1 : vector<1x256xf32>, i32 -> vector<1x256xf32>
    %2 = tpu.iota {dimensions = array<i32: 1>} : vector<1x256xi32>
    %c0_i32 = arith.constant 0 : i32
    %3 = vector.broadcast %c0_i32 : i32 to vector<1x256xi32>
    %4 = arith.cmpi eq, %2, %3 : vector<1x256xi32>
    %cst = arith.constant 0.000000e+00 : f32
    %5 = vector.broadcast %cst : f32 to vector<1x256xf32>
    %6 = arith.select %4, %5, %1 : vector<1x256xi1>, vector<1x256xf32>
    %cst_1 = arith.constant 9.700000e-01 : f32
    %7 = vector.broadcast %cst_1 : f32 to vector<1x256xf32>
    %8 = arith.mulf %7, %6 : vector<1x256xf32>
    %9 = arith.subf %0, %8 : vector<1x256xf32>
    %c0_2 = arith.constant 0 : index
    %c32 = arith.constant 32 : index
    %10 = vector.load %arg6[%c0_2, %c32] : memref<1x320xf32, #tpu.memory_space<vmem>>, vector<1x256xf32>
    tpu.vector_store %arg6[%c0_2, %c32], %9 {strides = array<i32>} : memref<1x320xf32, #tpu.memory_space<vmem>>, vector<1x256xf32>,
    %11 = vector.extract_strided_slice %9 {offsets = [0, 1], sizes = [1, 32], strides = [1, 1]} : vector<1x256xf32> to vector<1x32xf32>
    %c0_3 = arith.constant 0 : index
    %c0_4 = arith.constant 0 : index
    %12 = vector.load %arg2[%c0_3, %c0_4] : memref<32x32xf32, #tpu.memory_space<vmem>>, vector<32x32xf32>
    %cst_5 = arith.constant dense<0.000000e+00> : vector<1x32xf32>
    %13 = tpu.matmul %11, %12, %cst_5 {dimension_numbers = #tpu.dot_dimension_numbers<[1], [0], [0], [1], [0, 0, 1, 1], [], []>} : vector<1x32xf32>, vector<32x32xf32>, vector<1x32xf32> -> vector<1x32xf32>
    %c0_6 = arith.constant 0 : index
    %c0_7 = arith.constant 0 : index
    %14 = vector.load %arg6[%c0_6, %c0_7] : memref<1x320xf32, #tpu.memory_space<vmem>>, vector<1x32xf32>
    tpu.vector_store %arg6[%c0_6, %c0_7], %13 {strides = array<i32>} : memref<1x320xf32, #tpu.memory_space<vmem>>, vector<1x32xf32>,
    %15 = vector.extract_strided_slice %9 {offsets = [0, 223], sizes = [1, 32], strides = [1, 1]} : vector<1x256xf32> to vector<1x32xf32>
    %c0_8 = arith.constant 0 : index
    %c0_9 = arith.constant 0 : index
    %16 = vector.load %arg2[%c0_8, %c0_9] : memref<32x32xf32, #tpu.memory_space<vmem>>, vector<32x32xf32>
    %cst_10 = arith.constant dense<0.000000e+00> : vector<1x32xf32>
    %17 = tpu.matmul %15, %16, %cst_10 {dimension_numbers = #tpu.dot_dimension_numbers<[1], [0], [0], [1], [0, 0, 1, 1], [], []>} : vector<1x32xf32>, vector<32x32xf32>, vector<1x32xf32> -> vector<1x32xf32>
    %c0_11 = arith.constant 0 : index
    %c288 = arith.constant 288 : index
    %18 = vector.load %arg6[%c0_11, %c288] : memref<1x320xf32, #tpu.memory_space<vmem>>, vector<1x32xf32>
    tpu.vector_store %arg6[%c0_11, %c288], %17 {strides = array<i32>} : memref<1x320xf32, #tpu.memory_space<vmem>>, vector<1x32xf32>,
    %c0_12 = arith.constant 0 : index
    %c0_13 = arith.constant 0 : index
    %19 = vector.load %arg6[%c0_12, %c0_13] : memref<1x320xf32, #tpu.memory_space<vmem>>, vector<1x64xf32>
    %c0_14 = arith.constant 0 : index
    %c0_15 = arith.constant 0 : index
    %20 = vector.load %arg7[%c0_14, %c0_15] : memref<17x64xf32, #tpu.memory_space<vmem>>, vector<1x64xf32>
    tpu.vector_store %arg7[%c0_14, %c0_15], %19 {strides = array<i32>} : memref<17x64xf32, #tpu.memory_space<vmem>>, vector<1x64xf32>,
    %c0_16 = arith.constant 0 : index
    %c16 = arith.constant 16 : index
    %21 = vector.load %arg6[%c0_16, %c16] : memref<1x320xf32, #tpu.memory_space<vmem>>, vector<1x64xf32>
    %c1 = arith.constant 1 : index
    %c0_17 = arith.constant 0 : index
    %22 = vector.load %arg7[%c1, %c0_17] : memref<17x64xf32, #tpu.memory_space<vmem>>, vector<1x64xf32>
    tpu.vector_store %arg7[%c1, %c0_17], %21 {strides = array<i32>} : memref<17x64xf32, #tpu.memory_space<vmem>>, vector<1x64xf32>,
    %c0_18 = arith.constant 0 : index
    %c32_19 = arith.constant 32 : index
    %23 = vector.load %arg6[%c0_18, %c32_19] : memref<1x320xf32, #tpu.memory_space<vmem>>, vector<1x64xf32>
    %c2 = arith.constant 2 : index
    %c0_20 = arith.constant 0 : index
    %24 = vector.load %arg7[%c2, %c0_20] : memref<17x64xf32, #tpu.memory_space<vmem>>, vector<1x64xf32>
    tpu.vector_store %arg7[%c2, %c0_20], %23 {strides = array<i32>} : memref<17x64xf32, #tpu.memory_space<vmem>>, vector<1x64xf32>,
    %c0_21 = arith.constant 0 : index
    %c48 = arith.constant 48 : index
    %25 = vector.load %arg6[%c0_21, %c48] : memref<1x320xf32, #tpu.memory_space<vmem>>, vector<1x64xf32>
    %c3 = arith.constant 3 : index
    %c0_22 = arith.constant 0 : index
    %26 = vector.load %arg7[%c3, %c0_22] : memref<17x64xf32, #tpu.memory_space<vmem>>, vector<1x64xf32>
    tpu.vector_store %arg7[%c3, %c0_22], %25 {strides = array<i32>} : memref<17x64xf32, #tpu.memory_space<vmem>>, vector<1x64xf32>,
    %c0_23 = arith.constant 0 : index
    %c64 = arith.constant 64 : index
    %27 = vector.load %arg6[%c0_23, %c64] : memref<1x320xf32, #tpu.memory_space<vmem>>, vector<1x64xf32>
    %c4 = arith.constant 4 : index
    %c0_24 = arith.constant 0 : index
    %28 = vector.load %arg7[%c4, %c0_24] : memref<17x64xf32, #tpu.memory_space<vmem>>, vector<1x64xf32>
    tpu.vector_store %arg7[%c4, %c0_24], %27 {strides = array<i32>} : memref<17x64xf32, #tpu.memory_space<vmem>>, vector<1x64xf32>,
    %c0_25 = arith.constant 0 : index
    %c80 = arith.constant 80 : index
    %29 = vector.load %arg6[%c0_25, %c80] : memref<1x320xf32, #tpu.memory_space<vmem>>, vector<1x64xf32>
    %c5 = arith.constant 5 : index
    %c0_26 = arith.constant 0 : index
    %30 = vector.load %arg7[%c5, %c0_26] : memref<17x64xf32, #tpu.memory_space<vmem>>, vector<1x64xf32>
    tpu.vector_store %arg7[%c5, %c0_26], %29 {strides = array<i32>} : memref<17x64xf32, #tpu.memory_space<vmem>>, vector<1x64xf32>,
    %c0_27 = arith.constant 0 : index
    %c96 = arith.constant 96 : index
    %31 = vector.load %arg6[%c0_27, %c96] : memref<1x320xf32, #tpu.memory_space<vmem>>, vector<1x64xf32>
    %c6 = arith.constant 6 : index
    %c0_28 = arith.constant 0 : index
    %32 = vector.load %arg7[%c6, %c0_28] : memref<17x64xf32, #tpu.memory_space<vmem>>, vector<1x64xf32>
    tpu.vector_store %arg7[%c6, %c0_28], %31 {strides = array<i32>} : memref<17x64xf32, #tpu.memory_space<vmem>>, vector<1x64xf32>,
    %c0_29 = arith.constant 0 : index
    %c112 = arith.constant 112 : index
    %33 = vector.load %arg6[%c0_29, %c112] : memref<1x320xf32, #tpu.memory_space<vmem>>, vector<1x64xf32>
    %c7 = arith.constant 7 : index
    %c0_30 = arith.constant 0 : index
    %34 = vector.load %arg7[%c7, %c0_30] : memref<17x64xf32, #tpu.memory_space<vmem>>, vector<1x64xf32>
    tpu.vector_store %arg7[%c7, %c0_30], %33 {strides = array<i32>} : memref<17x64xf32, #tpu.memory_space<vmem>>, vector<1x64xf32>,
    %c0_31 = arith.constant 0 : index
    %c128 = arith.constant 128 : index
    %35 = vector.load %arg6[%c0_31, %c128] : memref<1x320xf32, #tpu.memory_space<vmem>>, vector<1x64xf32>
    %c8 = arith.constant 8 : index
    %c0_32 = arith.constant 0 : index
    %36 = vector.load %arg7[%c8, %c0_32] : memref<17x64xf32, #tpu.memory_space<vmem>>, vector<1x64xf32>
    tpu.vector_store %arg7[%c8, %c0_32], %35 {strides = array<i32>} : memref<17x64xf32, #tpu.memory_space<vmem>>, vector<1x64xf32>,
    %c0_33 = arith.constant 0 : index
    %c144 = arith.constant 144 : index
    %37 = vector.load %arg6[%c0_33, %c144] : memref<1x320xf32, #tpu.memory_space<vmem>>, vector<1x64xf32>
    %c9 = arith.constant 9 : index
    %c0_34 = arith.constant 0 : index
    %38 = vector.load %arg7[%c9, %c0_34] : memref<17x64xf32, #tpu.memory_space<vmem>>, vector<1x64xf32>
    tpu.vector_store %arg7[%c9, %c0_34], %37 {strides = array<i32>} : memref<17x64xf32, #tpu.memory_space<vmem>>, vector<1x64xf32>,
    %c0_35 = arith.constant 0 : index
    %c160 = arith.constant 160 : index
    %39 = vector.load %arg6[%c0_35, %c160] : memref<1x320xf32, #tpu.memory_space<vmem>>, vector<1x64xf32>
    %c10 = arith.constant 10 : index
    %c0_36 = arith.constant 0 : index
    %40 = vector.load %arg7[%c10, %c0_36] : memref<17x64xf32, #tpu.memory_space<vmem>>, vector<1x64xf32>
    tpu.vector_store %arg7[%c10, %c0_36], %39 {strides = array<i32>} : memref<17x64xf32, #tpu.memory_space<vmem>>, vector<1x64xf32>,
    %c0_37 = arith.constant 0 : index
    %c176 = arith.constant 176 : index
    %41 = vector.load %arg6[%c0_37, %c176] : memref<1x320xf32, #tpu.memory_space<vmem>>, vector<1x64xf32>
    %c11 = arith.constant 11 : index
    %c0_38 = arith.constant 0 : index
    %42 = vector.load %arg7[%c11, %c0_38] : memref<17x64xf32, #tpu.memory_space<vmem>>, vector<1x64xf32>
    tpu.vector_store %arg7[%c11, %c0_38], %41 {strides = array<i32>} : memref<17x64xf32, #tpu.memory_space<vmem>>, vector<1x64xf32>,
    %c0_39 = arith.constant 0 : index
    %c192 = arith.constant 192 : index
    %43 = vector.load %arg6[%c0_39, %c192] : memref<1x320xf32, #tpu.memory_space<vmem>>, vector<1x64xf32>
    %c12 = arith.constant 12 : index
    %c0_40 = arith.constant 0 : index
    %44 = vector.load %arg7[%c12, %c0_40] : memref<17x64xf32, #tpu.memory_space<vmem>>, vector<1x64xf32>
    tpu.vector_store %arg7[%c12, %c0_40], %43 {strides = array<i32>} : memref<17x64xf32, #tpu.memory_space<vmem>>, vector<1x64xf32>,
    %c0_41 = arith.constant 0 : index
    %c208 = arith.constant 208 : index
    %45 = vector.load %arg6[%c0_41, %c208] : memref<1x320xf32, #tpu.memory_space<vmem>>, vector<1x64xf32>
    %c13 = arith.constant 13 : index
    %c0_42 = arith.constant 0 : index
    %46 = vector.load %arg7[%c13, %c0_42] : memref<17x64xf32, #tpu.memory_space<vmem>>, vector<1x64xf32>
    tpu.vector_store %arg7[%c13, %c0_42], %45 {strides = array<i32>} : memref<17x64xf32, #tpu.memory_space<vmem>>, vector<1x64xf32>,
    %c0_43 = arith.constant 0 : index
    %c224 = arith.constant 224 : index
    %47 = vector.load %arg6[%c0_43, %c224] : memref<1x320xf32, #tpu.memory_space<vmem>>, vector<1x64xf32>
    %c14 = arith.constant 14 : index
    %c0_44 = arith.constant 0 : index
    %48 = vector.load %arg7[%c14, %c0_44] : memref<17x64xf32, #tpu.memory_space<vmem>>, vector<1x64xf32>
    tpu.vector_store %arg7[%c14, %c0_44], %47 {strides = array<i32>} : memref<17x64xf32, #tpu.memory_space<vmem>>, vector<1x64xf32>,
    %c0_45 = arith.constant 0 : index
    %c240 = arith.constant 240 : index
    %49 = vector.load %arg6[%c0_45, %c240] : memref<1x320xf32, #tpu.memory_space<vmem>>, vector<1x64xf32>
    %c15 = arith.constant 15 : index
    %c0_46 = arith.constant 0 : index
    %50 = vector.load %arg7[%c15, %c0_46] : memref<17x64xf32, #tpu.memory_space<vmem>>, vector<1x64xf32>
    tpu.vector_store %arg7[%c15, %c0_46], %49 {strides = array<i32>} : memref<17x64xf32, #tpu.memory_space<vmem>>, vector<1x64xf32>,
    %c0_47 = arith.constant 0 : index
    %c256 = arith.constant 256 : index
    %51 = vector.load %arg6[%c0_47, %c256] : memref<1x320xf32, #tpu.memory_space<vmem>>, vector<1x64xf32>
    %c16_48 = arith.constant 16 : index
    %c0_49 = arith.constant 0 : index
    %52 = vector.load %arg7[%c16_48, %c0_49] : memref<17x64xf32, #tpu.memory_space<vmem>>, vector<1x64xf32>
    tpu.vector_store %arg7[%c16_48, %c0_49], %51 {strides = array<i32>} : memref<17x64xf32, #tpu.memory_space<vmem>>, vector<1x64xf32>,
    %c0_50 = arith.constant 0 : index
    %c0_51 = arith.constant 0 : index
    %53 = vector.load %arg7[%c0_50, %c0_51] : memref<17x64xf32, #tpu.memory_space<vmem>>, vector<17x64xf32>
    %c0_52 = arith.constant 0 : index
    %c0_53 = arith.constant 0 : index
    %54 = vector.load %arg3[%c0_52, %c0_53] : memref<64x66xf32, #tpu.memory_space<vmem>>, vector<64x66xf32>
    %cst_54 = arith.constant dense<0.000000e+00> : vector<17x66xf32>
    %55 = tpu.matmul %53, %54, %cst_54 {dimension_numbers = #tpu.dot_dimension_numbers<[1], [0], [0], [1], [0, 0, 1, 1], [], []>} : vector<17x64xf32>, vector<64x66xf32>, vector<17x66xf32> -> vector<17x66xf32>
    %56 = vector.extract_strided_slice %55 {offsets = [0, 0], sizes = [17, 33], strides = [1, 1]} : vector<17x66xf32> to vector<17x33xf32>
    %57 = vector.extract_strided_slice %55 {offsets = [0, 33], sizes = [17, 33], strides = [1, 1]} : vector<17x66xf32> to vector<17x33xf32>
    %58 = arith.mulf %56, %56 : vector<17x33xf32>
    %59 = arith.mulf %57, %57 : vector<17x33xf32>
    %60 = arith.addf %58, %59 : vector<17x33xf32>
    %61 = math.sqrt %60 : vector<17x33xf32>
    %c0_55 = arith.constant 0 : index
    %c0_56 = arith.constant 0 : index
    %62 = vector.load %arg4[%c0_55, %c0_56] : memref<16x33xf32, #tpu.memory_space<vmem>>, vector<16x33xf32>
    %cst_57 = arith.constant dense<0.000000e+00> : vector<16x17xf32>
    %63 = tpu.matmul %62, %61, %cst_57 {dimension_numbers = #tpu.dot_dimension_numbers<[1], [1], [0], [0], [0, 0, 1, 0], [], []>} : vector<16x33xf32>, vector<17x33xf32>, vector<16x17xf32> -> vector<16x17xf32>
    %cst_58 = arith.constant 9.99999974E-6 : f32
    %64 = vector.broadcast %cst_58 : f32 to vector<16x17xf32>
    %65 = arith.maximumf %63, %64 : vector<16x17xf32>
    %66 = math.log %65 : vector<16x17xf32>
    %c0_59 = arith.constant 0 : index
    %c0_60 = arith.constant 0 : index
    %67 = vector.load %arg5[%c0_59, %c0_60] : memref<16x17xf32, #tpu.memory_space<vmem>>, vector<16x17xf32>
    tpu.vector_store %arg5[%c0_59, %c0_60], %66 {strides = array<i32>} : memref<16x17xf32, #tpu.memory_space<vmem>>, vector<16x17xf32>,
    return
  }
  func.func @transform_0(%arg0: i32) -> (i32, i32) {
    %c0_i32 = arith.constant 0 : i32
    %c0_i32_0 = arith.constant 0 : i32
    %c0_i32_1 = arith.constant 0 : i32
    return %c0_i32, %c0_i32_0 : i32, i32
  }
  func.func @transform_1(%arg0: i32) -> (i32, i32) {
    %c0_i32 = arith.constant 0 : i32
    %c0_i32_0 = arith.constant 0 : i32
    %c0_i32_1 = arith.constant 0 : i32
    return %c0_i32, %c0_i32_0 : i32, i32
  }
  func.func @transform_2(%arg0: i32) -> (i32, i32) {
    %c0_i32 = arith.constant 0 : i32
    %c0_i32_0 = arith.constant 0 : i32
    %c0_i32_1 = arith.constant 0 : i32
    return %c0_i32, %c0_i32_0 : i32, i32
  }
  func.func @transform_3(%arg0: i32) -> (i32, i32) {
    %c0_i32 = arith.constant 0 : i32
    %c0_i32_0 = arith.constant 0 : i32
    %c0_i32_1 = arith.constant 0 : i32
    return %c0_i32, %c0_i32_0 : i32, i32
  }
  func.func @transform_4(%arg0: i32) -> (i32, i32) {
    %c0_i32 = arith.constant 0 : i32
    %c0_i32_0 = arith.constant 0 : i32
    %c0_i32_1 = arith.constant 0 : i32
    return %c0_i32, %c0_i32_0 : i32, i32
  }
}

</mosaic_0001>

<bundles_post_ra>
// kernel: wav2mel.1
= control target key start
LH: loop header
LB: loop body
LE: loop exit
PB: predicated region body
PF: predicated region fallthrough
CT: control target
= control target key end

     0   :  { %9 = vsyncpa [#allocation5], 0  ;;  %s1198_s0 = inlined_call_operand.hbm [shape: f32[1,256], index: 0, kind: input, shape index: {}]   ;;  %s1199_s1 = inlined_call_operand.hbm [shape: f32[32,32], index: 1, kind: input, shape index: {}]   ;;  %s1200_s2 = inlined_call_operand.hbm [shape: f32[64,66], index: 2, kind: input, shape index: {}]   ;;  %s1201_s3 = inlined_call_operand.hbm [shape: f32[16,33], index: 3, kind: input, shape index: {}]   ;;  %s1202_s4 = inlined_call_operand.hbm [shape: f32[16,17], index: 4, kind: output, shape index: {}]  }
   0x1   :  { %10 = vsyncpa [#allocation8], 0 }
   0x2   :  { %11 = vsyncpa [#allocation11], 0 }
   0x3   :  { %12 = vsyncpa [#allocation6], 0  ;;  %s1010_s15 = smov [#allocation7]  }
   0x4   :  { %s28_s16 = sshll.u32 %s1010_s15, 4  ;;  %s29_s16 = int_to_ptr.vmem [resolvable:$true] %s28_s16 }
   0x5   :  { %s910_s17 = scalar_lea.vmem %s29_s16, 512  ;;  %p915_p1 = scmp.lt.s32.totalorder %s29_s16, %s29_s16 }
   0x6   :  { %p911_p0 = scmp.ne.s32.totalorder %s29_s16, %s910_s17  ;;  %p916_p2 = scmp.lt.s32.totalorder %s910_s17, %s910_s17 }
   0x8   :  { %p917_p3 = por %p916_p2, %p915_p1 }
   0xa   :  { %p918_p4 = pnand %p917_p3, %p911_p0 }
   0xc   :  { %921 = shalt.err (!%p918_p4)
}
   0xd   :  { %s1011_s18 = smov 128   ;;  %s1012_s19 = smov 8  }
   0xe   :  { %34 = dma.hbm_to_vmem [thread:$0]  %s1199_s1, 512, %s29_s16, [#allocation8], %s1011_s18, %s1011_s18, %s1012_s19  }
   0xf   :  { %s1013_s22 = smov [#allocation4]   ;;  %s1014_s24 = smov [#allocation9]  }
  0x10   :  { %s19_s23 = sshll.u32 %s1013_s22, 4  ;;  %s40_s25 = sshll.u32 %s1014_s24, 4  ;;  %s20_s23 = int_to_ptr.vmem [resolvable:$true] %s19_s23  ;;  %s41_s25 = int_to_ptr.vmem [resolvable:$true] %s40_s25 }
  0x11   :  { %s930_s26 = scalar_lea.vmem %s20_s23, 32  ;;  %p935_p6 = scmp.lt.s32.totalorder %s20_s23, %s20_s23 }
  0x12   :  { %p931_p5 = scmp.ne.s32.totalorder %s20_s23, %s930_s26  ;;  %p936_p7 = scmp.lt.s32.totalorder %s930_s26, %s930_s26 }
  0x14   :  { %p937_p8 = por %p936_p7, %p935_p6 }
  0x16   :  { %p938_p9 = pnand %p937_p8, %p931_p5 }
  0x18   :  { %941 = shalt.err (!%p938_p9)
}
  0x19   :  { %22 = dma.hbm_to_vmem [thread:$0]  %s1198_s0, 32, %s20_s23, [#allocation5]  }
  0x1a   :  { %s950_s29 = scalar_lea.vmem %s41_s25, 1024  ;;  %p955_p11 = scmp.lt.s32.totalorder %s41_s25, %s41_s25 }
  0x1b   :  { %p951_p10 = scmp.ne.s32.totalorder %s41_s25, %s950_s29  ;;  %p956_p12 = scmp.lt.s32.totalorder %s950_s29, %s950_s29 }
  0x1d   :  { %p957_p13 = por %p956_p12, %p955_p11 }
  0x1f   :  { %p958_p0 = pnand %p957_p13, %p951_p10 }
  0x21   :  { %961 = shalt.err (!%p958_p0)
}
  0x22   :  { %46 = dma.hbm_to_vmem [thread:$0]  %s1200_s2, 1024, %s41_s25, [#allocation8], %s1011_s18, %s1011_s18, %s1012_s19  }
  0x23   :  { %s1015_s5 = smov [#allocation10]  }
  0x24   :  { %s52_s6 = sshll.u32 %s1015_s5, 4  ;;  %s53_s6 = int_to_ptr.vmem [resolvable:$true] %s52_s6 }
  0x25   :  { %s970_s7 = scalar_lea.vmem %s53_s6, 256  ;;  %p975_p2 = scmp.lt.s32.totalorder %s53_s6, %s53_s6 }
  0x26   :  { %p971_p1 = scmp.ne.s32.totalorder %s53_s6, %s970_s7  ;;  %p976_p3 = scmp.lt.s32.totalorder %s970_s7, %s970_s7 }
  0x28   :  { %p977_p4 = por %p976_p3, %p975_p2 }
  0x2a   :  { %p978_p5 = pnand %p977_p4, %p971_p1 }
  0x2c   :  { %981 = shalt.err (!%p978_p5)
}
  0x2d   :  { %58 = dma.hbm_to_vmem [thread:$0]  %s1201_s3, 256, %s53_s6, [#allocation11], %s1011_s18, %s1011_s18, %s1012_s19  }
  0x2e   :  { %1002 = dma.done.wait [#allocation5], 32  }
  0x2f   :  { %1003 = vsyncadd [#allocation5], 4294967264 }
  0x30   :  { %1004 = dma.done.wait [#allocation8], 1536  }
  0x31   :  { %1005 = vsyncadd [#allocation8], 4294965760 }
  0x32   :  { %1006 = dma.done.wait [#allocation11], 256  }
  0x33   :  { %1007 = vsyncadd [#allocation11], 4294967040  ;;  %v73_v0 = vlaneseq  ;;  %v71_v4 = vld [vmem:[#allocation4] sm:$0x3]  ;;  %s1016_s2 = smov 1   ;;  %v1017_v8 = vmov 0.0  }
  0x34   :  { %v133_v7 = vld [vmem:[#allocation7 + $0x18] sm:$0xff]  ;;  %815 = vmatprep.subr.mxu1 %v1017_v8  ;;  %v132_v9 = vld [vmem:[#allocation7 + $0x10] sm:$0xff]  ;;  %837 = vmatprep.subr.mxu0 %v1017_v8  ;;  %v131_v10 = vld [vmem:[#allocation7 + $0x8] sm:$0xff]  ;;  %v1018_v12 = vmov 1966171168   ;;  %vm1019_vm2 = vmmov 0  }
  0x35   :  { %v74_v1 = vshrl.u32 %v73_v0, 7  ;;  %816 = vmatpush3.msra.mxu1 %v133_v7  ;;  %v88_v11 = vand.u32 127, %v73_v0  ;;  %v103_v13 = vunpack.c.l.s4 %v1018_v12  ;;  %v130_v16 = vld [vmem:[#allocation7] sm:$0xff]  ;;  %823 = vmatprep.mubr.msk.f32.mxu1 %vm1019_vm2, %v1017_v8  ;;  %s1020_s3 = smov 32   ;;  %s1021_s9 = smov 127   ;;  %vm1099_vm3 = vcmp.ge.s32.totalorder %v73_v0, 32 }
  0x36   :  { %817 = vmatprep.subr.mxu1 %v1017_v8  ;;  %853 = vmatprep.mubr.msk.f32.mxu0 %vm1019_vm2, %v1017_v8  ;;  %s1022_s10 = smov 33   ;;  %vm127_vm4 = vcmp.lt.s32.totalorder %v73_v0, 288  ;;  %vm122_vm5 = vcmask 261120   ;;  %vm320_vm7 = vcmask 516096   ;;  %vm213_vm8 = vcmp.lt.s32.totalorder %v73_v0, 32  ;;  %s1023_s11 = smov 48  }
  0x37   :  { %v1078_v2 = vsub.s32 0, %v74_v1  ;;  %v1080_v3 = vsub.s32 1, %v74_v1  ;;  %818 = vmatpush3.msra.mxu1 %v132_v9  ;;  %vm89_vm0 = vcmp.lt.s32.totalorder %v88_v11, 1  ;;  %vm93_vm1 = vcmp.eq.s32.totalorder %v88_v11, 0  ;;  %vm128_vm6 = vmand %vm1099_vm3, %vm127_vm4  ;;  %v520_v47 = vld [vmem:[#allocation9 + $0x38] sm:$0xff]  ;;  %v519_v50 = vld [vmem:[#allocation9 + $0x30] sm:$0xff] }
  0x38   :  { %819 = vmatprep.subr.mxu1 %v1017_v8  ;;  %v104_v15 = vunpack.c.0.s8 %v103_v13  ;;  %838 = vmatpush3.msra.mxu0 %v520_v47  ;;  %v518_v52 = vld [vmem:[#allocation9 + $0x28] sm:$0xff]  ;;  %v517_v54 = vld [vmem:[#allocation9 + $0x20] sm:$0xff]  ;;  %s1024_s12 = smov 16   ;;  %v516_v56 = vld [vmem:[#allocation9 + $0x18] sm:$0xff]  ;;  %s1025_s13 = smov 112   ;;  %vm316_vm9 = vcmp.lt.s32.totalorder %v73_v0, 64 }
  0x39   :  { %v76_v5 = vrot.slane %v71_v4, %v1078_v2  ;;  %v80_v6 = vrot.slane %v71_v4, %v1080_v3  ;;  %820 = vmatpush3.msra.mxu1 %v131_v10  ;;  %839 = vmatprep.subr.mxu0 %v1017_v8  ;;  %v515_v58 = vld [vmem:[#allocation9 + $0x10] sm:$0xff]  ;;  %v514_v60 = vld [vmem:[#allocation9 + $0x8] sm:$0xff]  ;;  %v513_v61 = vld [vmem:[#allocation9] sm:$0xff]  ;;  %s1026_s14 = smov 80   ;;  %s1027_s15 = smov 96   ;;  %vm376_vm11 = vcmask 392192  }
  0x3a   :  { %821 = vmatprep.subr.mxu1 %v1017_v8  ;;  %v107_v22 = vsub.s32 %v104_v15, %v74_v1  ;;  %840 = vmatpush3.msra.mxu0 %v519_v50  ;;  %s1028_s16 = smov 64   ;;  %vm317_vm10 = vmand %vm1099_vm3, %vm316_vm9  ;;  %vm411_vm12 = vcmask 130048   ;;  %vm521_vm13 = vcmask 523264   ;;  %s1029_s17 = smov 95   ;;  %vm652_vm14 = vcmask 269312  }
  0x3b   :  { %83 = vrot.lane.b32.xlu0 %v76_v5, %s1016_s2  ;;  %822 = vmatpush3.msra.mxu1 %v130_v16  ;;  %s1030_s20 = smov [#allocation12]  }
  0x3c   :  { %826 = vmatprep.subr.mxu1 %v1017_v8  ;;  %841 = vmatprep.subr.mxu0 %v1017_v8  ;;  %s757_s21 = sshll.u32 %s1030_s20, 4  ;;  %s758_s21 = int_to_ptr.vmem [resolvable:$true] %s757_s21 }
  0x3d   :  { %842 = vmatpush3.msra.mxu0 %v518_v52  ;;  %s982_s22 = scalar_lea.vmem %s758_s21, 256  ;;  %p987_p7 = scmp.lt.s32.totalorder %s758_s21, %s758_s21 }
  0x3e   :  { %843 = vmatprep.subr.mxu0 %v1017_v8  ;;  %p983_p6 = scmp.ne.s32.totalorder %s758_s21, %s982_s22  ;;  %p988_p8 = scmp.lt.s32.totalorder %s982_s22, %s982_s22 }
  0x3f   :  { %85 = vrot.lane.b32.xlu0 %v80_v6, %s1016_s2  ;;  %844 = vmatpush3.msra.mxu0 %v517_v54 }
  0x40   :  { %845 = vmatprep.subr.mxu0 %v1017_v8  ;;  %p989_p9 = por %p988_p8, %p987_p7 }
  0x41   :  { %846 = vmatpush3.msra.mxu0 %v516_v56 }
  0x42   :  { %847 = vmatprep.subr.mxu0 %v1017_v8  ;;  %p990_p10 = pnand %p989_p9, %p983_p6 }
  0x43   :  { %848 = vmatpush3.msra.mxu0 %v515_v58 }
  0x44   :  { %849 = vmatprep.subr.mxu0 %v1017_v8 }
  0x45   :  { %850 = vmatpush3.msra.mxu0 %v514_v60 }
  0x46   :  { %851 = vmatprep.subr.mxu0 %v1017_v8 }
  0x47   :  { %852 = vmatpush3.msra.mxu0 %v513_v61 }
  0xad   :  { %v84_v14 = vpop.permute.xlu0 %83 }
  0xb1   :  { %v86_v17 = vpop.permute.xlu0 %85 }
  0xb2   :  { %v90_v18 = vsel %vm89_vm0, %v84_v14, %v86_v17  ;;  %v91_v19 = vsel %vm89_vm0, %v86_v17, %v84_v14 }
  0xb3   :  { %v95_v20 = vsel %vm93_vm1, 0.0, %v91_v19  ;;  %v98_v21 = vmul.f32 0.97, %v90_v18 }
  0xb4   :  { %v97_v23 = vmul.f32 0.97, %v95_v20 }
  0xb6   :  { %v101_v24 = vcombine.low %v97_v23, %v98_v21 }
  0xb8   :  { %v108_v25 = vrot.slane %v101_v24, %v107_v22 }
  0xba   :  { %v115_v26 = vrot.slane %v108_v25, %v107_v22 }
  0xbc   :  { %v117_v27 = vsub.f32 %v71_v4, %v115_v26 }
  0xbe   :  { %119 = vrot.lane.b32.xlu0 %v117_v27, %s1020_s3  ;;  %v137_v28 = vrot.slane %v117_v27, %v1078_v2  ;;  %v223_v29 = vrot.slane %v117_v27, %v1080_v3 }
  0xc0   :  { %138 = vrot.lane.b32.xlu1 %v137_v28, %s1021_s9 }
  0xc4   :  { %224 = vrot.lane.b32.xlu1 %v223_v29, %s1022_s10 }
 0x130   :  { %v120_v31 = vpop.permute.xlu0 %119 }
 0x131   :  { %v121_v32 = vrot.slane %v120_v31, 7 }
 0x132   :  { %v139_v33 = vpop.permute.xlu1 %138 }
 0x133   :  { %v123_v34 = vsel %vm122_vm5, %v121_v32, %v120_v31  ;;  %824 = vmatmul.mubr.msk.f32.vlgmr.msra.gmra.mxu1 %vm122_vm5, %v139_v33 }
 0x134   :  { %129 = vst.msk [vmem:[#allocation2] sm:$0x7] %vm128_vm6, %v123_v34  ;;  %827 = vmatpush3.msra.mxu1 %v133_v7  ;;  %834 = vmatprep.mubr.msk.f32.mxu1 %vm1019_vm2, %v1017_v8 }
 0x135   :  { %828 = vmatprep.subr.mxu1 %v1017_v8 }
 0x136   :  { %829 = vmatpush3.msra.mxu1 %v132_v9  ;;  %v225_v35 = vpop.permute.xlu1 %224 }
 0x137   :  { %830 = vmatprep.subr.mxu1 %v1017_v8 }
 0x138   :  { %831 = vmatpush3.msra.mxu1 %v131_v10 }
 0x139   :  { %832 = vmatprep.subr.mxu1 %v1017_v8 }
 0x13a   :  { %833 = vmatpush3.msra.mxu1 %v130_v16 }
 0x13b   :  { %v415_v36 = vld [vmem:[#allocation2 + $0x1] sm:$0x1]  ;;  %835 = vmatmul.mubr.msk.f32.vlgmr.msra.gmra.mxu1 %vm122_vm5, %v225_v35 }
 0x13c   :  { %416 = vst.msk [vmem:[#allocation3 + $0x8] sm:$0x1] %vm320_vm7, %v415_v36  ;;  %v777_v62 = vld [vmem:[#allocation2 + $0x1] ss:$0 sm:$0xff] }
 0x1f3   :  { %v208_v37 = vpop.f32.mrf.mxu1 }
 0x1f4   :  { %215 = vst.msk [vmem:[#allocation2] sm:$0x1] %vm213_vm8, %v208_v37 }
 0x1f5   :  { %v825_v38 = vpop.f32.mrf.mxu1 }
 0x1fb   :  { %v319_v39 = vld [vmem:[#allocation2] sm:$0x1]  ;;  %v294_v40 = vpop.f32.mrf.mxu1 }
 0x1fc   :  { %v362_v41 = vld [vmem:[#allocation2] sm:$0x3]  ;;  %v305_v42 = vrot.slane %v294_v40, %v107_v22  ;;  %321 = vst.msk [vmem:[#allocation3] sm:$0x1] %vm320_vm7, %v319_v39 }
 0x1fd   :  { %v367_v43 = vrot.slane %v362_v41, %v1078_v2  ;;  %v836_v44 = vpop.f32.mrf.mxu1  ;;  %v380_v45 = vld [vmem:[#allocation2] sm:$0x3]  ;;  %v371_v51 = vrot.slane %v362_v41, %v1080_v3 }
 0x1fe   :  { %v312_v46 = vrot.slane %v305_v42, %v107_v22  ;;  %v385_v48 = vrot.slane %v380_v45, %v1078_v2  ;;  %v397_v49 = vld [vmem:[#allocation2] sm:$0x3]  ;;  %v389_v55 = vrot.slane %v380_v45, %v1080_v3 }
 0x1ff   :  { %372 = vrot.lane.b32.xlu0 %v367_v43, %s1023_s11  ;;  %v402_v53 = vrot.slane %v397_v49, %v1078_v2  ;;  %v773_v57 = vld [vmem:[#allocation2] ss:$0 sm:$0xff]  ;;  %v406_v59 = vrot.slane %v397_v49, %v1080_v3 }
 0x200   :  { %313 = vrot.lane.b32.xlu1 %v312_v46, %s1020_s3  ;;  %v650_v49 = vld [vmem:[#allocation10] sm:$0xff] }
 0x201   :  { %868 = vmatprep.mubr.msk.f32.mxu1 %vm652_vm14, %v650_v49 }
 0x203   :  { %390 = vrot.lane.b32.xlu0 %v385_v48, %s1020_s3 }
 0x204   :  { %374 = vrot.lane.b32.xlu1 %v371_v51, %s1023_s11 }
 0x207   :  { %407 = vrot.lane.b32.xlu0 %v402_v53, %s1024_s12 }
 0x208   :  { %392 = vrot.lane.b32.xlu1 %v389_v55, %s1020_s3 }
 0x20b   :  { %328 = vrot.lane.b32.xlu0 %v773_v57, %s1025_s13 }
 0x20c   :  { %409 = vrot.lane.b32.xlu1 %v406_v59, %s1024_s12 }
 0x20f   :  { %348 = vrot.lane.b32.xlu0 %v773_v57, %s1026_s14 }
 0x210   :  { %338 = vrot.lane.b32.xlu1 %v773_v57, %s1027_s15 }
 0x213   :  { %423 = vrot.lane.b32.xlu0 %v777_v62, %s1025_s13 }
 0x214   :  { %358 = vrot.lane.b32.xlu1 %v773_v57, %s1028_s16 }
 0x218   :  { %433 = vrot.lane.b32.xlu1 %v777_v62, %s1027_s15 }
 0x271   :  { %v373_v63 = vpop.permute.xlu0 %372 }
 0x272   :  { %v314_v1 = vpop.permute.xlu1 %313 }
 0x273   :  { %318 = vst.msk [vmem:[#allocation2 + $0x2] sm:$0x1] %vm317_vm10, %v314_v1 }
 0x275   :  { %v391_v4 = vpop.permute.xlu0 %390 }
 0x276   :  { %v375_v5 = vpop.permute.xlu1 %374 }
 0x277   :  { %v377_v6 = vsel %vm376_vm11, %v373_v63, %v375_v5 }
 0x278   :  { %379 = vst.msk [vmem:[#allocation3 + $0x5] sm:$0x1] %vm320_vm7, %v377_v6 }
 0x279   :  { %v408_v7 = vpop.permute.xlu0 %407 }
 0x27a   :  { %v508_v9 = vld [vmem:[#allocation2 + $0x2] sm:$0x1]  ;;  %v393_v10 = vpop.permute.xlu1 %392 }
 0x27b   :  { %v457_v11 = vld [vmem:[#allocation2 + $0x1] sm:$0x3]  ;;  %509 = vst.msk [vmem:[#allocation3 + $0x10] sm:$0x1] %vm320_vm7, %v508_v9  ;;  %v394_v0 = vsel %vm122_vm5, %v391_v4, %v393_v10  ;;  %v651_v10 = vld [vmem:[#allocation10 + $0x8] sm:$0xff] }
 0x27c   :  { %v466_v12 = vrot.slane %v457_v11, %v1080_v3  ;;  %v462_v13 = vrot.slane %v457_v11, %v1078_v2  ;;  %396 = vst.msk [vmem:[#allocation3 + $0x6] sm:$0x1] %vm320_vm7, %v394_v0  ;;  %v474_v15 = vld [vmem:[#allocation2 + $0x1] sm:$0x3] }
 0x27d   :  { %v329_v14 = vpop.permute.xlu0 %328  ;;  %v483_v18 = vrot.slane %v474_v15, %v1080_v3  ;;  %v479_v19 = vrot.slane %v474_v15, %v1078_v2  ;;  %v491_v21 = vld [vmem:[#allocation2 + $0x1] sm:$0x3] }
 0x27e   :  { %331 = vst.msk [vmem:[#allocation3 + $0x1] sm:$0x1] %vm320_vm7, %v329_v14  ;;  %469 = vrot.lane.b32.xlu1 %v466_v12, %s1023_s11  ;;  %467 = vrot.lane.b32.xlu0 %v462_v13, %s1023_s11  ;;  %v410_v16 = vpop.permute.xlu1 %409  ;;  %v500_v23 = vrot.slane %v491_v21, %v1080_v3  ;;  %v496_v24 = vrot.slane %v491_v21, %v1078_v2 }
 0x27f   :  { %v412_v17 = vsel %vm411_vm12, %v408_v7, %v410_v16 }
 0x280   :  { %414 = vst.msk [vmem:[#allocation3 + $0x7] sm:$0x1] %vm320_vm7, %v412_v17 }
 0x281   :  { %v349_v20 = vpop.permute.xlu0 %348 }
 0x282   :  { %351 = vst.msk [vmem:[#allocation3 + $0x3] sm:$0x1] %vm320_vm7, %v349_v20  ;;  %486 = vrot.lane.b32.xlu1 %v483_v18, %s1020_s3  ;;  %484 = vrot.lane.b32.xlu0 %v479_v19, %s1020_s3  ;;  %v339_v22 = vpop.permute.xlu1 %338  ;;  %v512_v39 = vld [vmem:[#allocation3 + $0x10] sm:$0x1] }
 0x283   :  { %341 = vst.msk [vmem:[#allocation3 + $0x2] sm:$0x1] %vm320_vm7, %v339_v22 }
 0x285   :  { %v424_v25 = vpop.permute.xlu0 %423 }
 0x286   :  { %426 = vst.msk [vmem:[#allocation3 + $0x9] sm:$0x1] %vm320_vm7, %v424_v25  ;;  %503 = vrot.lane.b32.xlu1 %v500_v23, %s1024_s12  ;;  %501 = vrot.lane.b32.xlu0 %v496_v24, %s1024_s12  ;;  %v359_v26 = vpop.permute.xlu1 %358 }
 0x287   :  { %361 = vst.msk [vmem:[#allocation3 + $0x4] sm:$0x1] %vm320_vm7, %v359_v26 }
 0x28a   :  { %453 = vrot.lane.b32.xlu1 %v777_v62, %s1028_s16  ;;  %443 = vrot.lane.b32.xlu0 %v777_v62, %s1026_s14  ;;  %v434_v27 = vpop.permute.xlu1 %433 }
 0x28b   :  { %436 = vst.msk [vmem:[#allocation3 + $0xa] sm:$0x1] %vm320_vm7, %v434_v27 }
 0x28e   :  { %v510_v3 = vld [vmem:[#allocation3] sm:$0xff] }
 0x28f   :  { %854 = vmatmul.mubr.msk.f32.vlgmr.msra.gmra.mxu0 %vm521_vm13, %v510_v3 }
 0x290   :  { %856 = vmatprep.mubr.msk.f32.mxu0 %vm1019_vm2, %v1017_v8 }
 0x2f0   :  { %v468_v2 = vpop.permute.xlu0 %467  ;;  %v470_v28 = vpop.permute.xlu1 %469 }
 0x2f1   :  { %v471_v29 = vsel %vm376_vm11, %v468_v2, %v470_v28 }
 0x2f2   :  { %473 = vst.msk [vmem:[#allocation3 + $0xd] sm:$0x1] %vm320_vm7, %v471_v29 }
 0x2f4   :  { %v485_v30 = vpop.permute.xlu0 %484  ;;  %v487_v31 = vpop.permute.xlu1 %486 }
 0x2f5   :  { %v488_v32 = vsel %vm122_vm5, %v485_v30, %v487_v31  ;;  %vm749_vm5 = vcmask 138240  }
 0x2f6   :  { %490 = vst.msk [vmem:[#allocation3 + $0xe] sm:$0x1] %vm320_vm7, %v488_v32 }
 0x2f8   :  { %v502_v33 = vpop.permute.xlu0 %501  ;;  %v504_v34 = vpop.permute.xlu1 %503 }
 0x2f9   :  { %v505_v35 = vsel %vm411_vm12, %v502_v33, %v504_v34 }
 0x2fa   :  { %507 = vst.msk [vmem:[#allocation3 + $0xf] sm:$0x1] %vm320_vm7, %v505_v35 }
 0x2fc   :  { %v444_v36 = vpop.permute.xlu0 %443  ;;  %v454_v37 = vpop.permute.xlu1 %453 }
 0x2fd   :  { %446 = vst.msk [vmem:[#allocation3 + $0xb] sm:$0x1] %vm320_vm7, %v444_v36  ;;  %456 = vst.msk [vmem:[#allocation3 + $0xc] sm:$0x1] %vm320_vm7, %v454_v37 }
 0x304   :  { %v511_v38 = vld [vmem:[#allocation3 + $0x8] sm:$0xff] }
 0x305   :  { %857 = vmatmul.mubr.msk.f32.gmra.mxu0 %vm521_vm13, %v511_v38 }
 0x306   :  { %859 = vmatprep.mubr.msk.f32.mxu0 %vm1019_vm2, %v1017_v8 }
 0x309   :  { %860 = vmatmul.mubr.msk.f32.gmra.mxu0 %vm521_vm13, %v512_v39 }
 0x34f   :  { %v597_v40 = vpop.f32.mrf.mxu0 }
 0x350   :  { %v611_v48 = vmul.f32 %v597_v40, %v597_v40 }
 0x351   :  { %v855_v41 = vpop.f32.mrf.mxu0 }
 0x3c5   :  { %v602_v42 = vpop.f32.mrf.mxu0 }
 0x3c6   :  { %v612_v43 = vmul.f32 %v602_v42, %v602_v42 }
 0x3c7   :  { %v858_v44 = vpop.f32.mrf.mxu0 }
 0x3c8   :  { %619 = vrot.lane.b32.xlu1 %v612_v43, %s1029_s17 }
 0x3c9   :  { %v607_v45 = vpop.f32.mrf.mxu0 }
 0x3ca   :  { %v613_v46 = vmul.f32 %v607_v45, %v607_v45 }
 0x3cb   :  { %v861_v47 = vpop.f32.mrf.mxu0 }
 0x3cc   :  { %621 = vrot.lane.b32.xlu0 %v613_v46, %s1029_s17 }
 0x3d0   :  { %617 = vrot.lane.b32.xlu0 %v611_v48, %s1029_s17 }
 0x43a   :  { %v620_v8 = vpop.permute.xlu1 %619 }
 0x43b   :  { %v627_v50 = vadd.f32 %v620_v8, %v612_v43 }
 0x43d   :  { %892 = vrsqrt.f32 %v627_v50  ;;  %vm638_vm0 = vcmp.eq.f32.partialorder %v627_v50, inf  ;;  %v641_v1 = vand.u32 2147483648, %v627_v50  ;;  %vm640_vm2 = vcmp.eq.f32.partialorder %v627_v50, 0.0 }
 0x43e   :  { %v622_v51 = vpop.permute.xlu0 %621 }
 0x43f   :  { %v628_v52 = vadd.f32 %v622_v51, %v613_v46 }
 0x441   :  { %894 = vrsqrt.f32 %v628_v52  ;;  %vm645_vm15 = vcmp.eq.f32.partialorder %v628_v52, inf  ;;  %v648_v59 = vand.u32 2147483648, %v628_v52  ;;  %vm647_vm1 = vcmp.eq.f32.partialorder %v628_v52, 0.0 }
 0x442   :  { %v618_v53 = vpop.permute.xlu0 %617 }
 0x443   :  { %v626_v54 = vadd.f32 %v618_v53, %v611_v48 }
 0x445   :  { %896 = vrsqrt.f32 %v626_v54  ;;  %vm631_vm3 = vcmp.eq.f32.partialorder %v626_v54, inf  ;;  %v634_v7 = vand.u32 2147483648, %v626_v54  ;;  %vm633_vm4 = vcmp.eq.f32.partialorder %v626_v54, 0.0 }
 0x44a   :  { %v893_v55 = vpop.eup %892 }
 0x44b   :  { %v637_v56 = vmul.f32 %v893_v55, %v627_v50 }
 0x44d   :  { %v639_v61 = vsel %vm638_vm0, %v627_v50, %v637_v56 }
 0x44e   :  { %v895_v57 = vpop.eup %894  ;;  %v642_v5 = vsel %vm640_vm2, %v641_v1, %v639_v61 }
 0x44f   :  { %v644_v58 = vmul.f32 %v895_v57, %v628_v52 }
 0x451   :  { %v646_v60 = vsel %vm645_vm15, %v628_v52, %v644_v58 }
 0x452   :  { %v897_v62 = vpop.eup %896  ;;  %v649_v63 = vsel %vm647_vm1, %v648_v59, %v646_v60 }
 0x453   :  { %862 = vmatprep.subr.msk.mxu1 %vm652_vm14, %v649_v63  ;;  %v630_v4 = vmul.f32 %v897_v62, %v626_v54 }
 0x454   :  { %863 = vmatpush3.xpose.msk.msra.mxu1 %vm652_vm14, %v649_v63 }
 0x455   :  { %864 = vmatprep.subr.msk.mxu1 %vm652_vm14, %v642_v5  ;;  %v632_v6 = vsel %vm631_vm3, %v626_v54, %v630_v4 }
 0x456   :  { %v635_v9 = vsel %vm633_vm4, %v634_v7, %v632_v6 }
 0x458   :  { %865 = vmatpush3.xpose.msk.msra.mxu1 %vm652_vm14, %v642_v5 }
 0x459   :  { %866 = vmatprep.subr.msk.mxu1 %vm652_vm14, %v635_v9 }
 0x45c   :  { %867 = vmatpush3.xpose.msk.msra.mxu1 %vm652_vm14, %v635_v9 }
 0x45f   :  { %869 = vmatmul.mubr.msk.f32.vlgmr.msra.gmra.mxu1 %vm652_vm14, %v651_v10 }
 0x51f   :  { %v870_v11 = vpop.f32.mrf.mxu1 }
 0x520   :  { %v744_v0 = vmax.f32 %v870_v11, 1e-05 }
 0x521   :  { %v734_v12 = vpop.f32.mrf.mxu1 }
 0x522   :  { %898 = vlog2.f32 %v744_v0  ;;  %v743_v13 = vmax.f32 %v734_v12, 1e-05 }
 0x524   :  { %900 = vlog2.f32 %v743_v13 }
 0x52f   :  { %v899_v14 = vpop.eup %898 }
 0x530   :  { %v748_v15 = vmul.f32 0.6931472, %v899_v14 }
 0x531   :  { %v901_v16 = vpop.eup %900 }
 0x532   :  { %v746_v17 = vmul.f32 0.6931472, %v901_v16  ;;  %751 = vst.msk [vmem:[#allocation12 + $0x8] sm:$0xff] %vm749_vm5, %v748_v15 }
 0x534   :  { %750 = vst.msk [vmem:[#allocation12] sm:$0xff] %vm749_vm5, %v746_v17 }
 0x535   :  { %993 = shalt.err (!%p990_p10)
}
 0x536   :  { %763 = dma.vmem_to_hbm [thread:$0]  %s758_s21, 256, %s1202_s4, [#allocation6], %s1011_s18, %s1011_s18, %s1012_s19  }
 0x537   :  { %1008 = dma.done.wait [#allocation6], 256  }
 0x538   :  { %1009 = vsyncadd [#allocation6], 4294967040 }
 0x539   :  { %767 = vsyncpa [#allocation5], 1 }
 0x53a   :  { %768 = vsyncpa [#allocation8], 1 }
 0x53b   :  { %769 = vsyncpa [#allocation11], 1 }
 0x53c   :  { %770 = vsyncpa [#allocation6], 1 }

</bundles_post_ra>
